<compile_context>
chip_gen: v6e
topology: v6e:2x2x1
jax: 0.10.0
libtpu: 0.0.40
codegen_flags: <defaults>
</compile_context>

<pallas_src>
import math
import functools

import jax
import jax.numpy as jnp
from jax import lax
from jax.experimental import pallas as pl
from jax.experimental.pallas import tpu as pltpu


# --------------------------------------------------------------------------
# Tiling helpers
# --------------------------------------------------------------------------
_TO_TARGET = 256   # Out-tile target (fits v7x 64 MiB VMEM comfortably, MXU aligned)
_TI_TARGET = 512   # In (reduction)-tile target


def _round_up(x, m):
    return ((x + m - 1) // m) * m


def _pick_tile(dim, target):
    """Pad `dim` to a multiple of 128 and pick the largest tile <= target that
    divides the padded extent (tile is always a multiple of 128)."""
    padded = _round_up(dim, 128)
    tile = min(target, padded)
    while tile > 128 and padded % tile != 0:
        tile -= 128
    return padded, tile


def _pad2d(a, rows, cols):
    pr, pc = rows - a.shape[0], cols - a.shape[1]
    if pr == 0 and pc == 0:
        return a
    return jnp.pad(a, ((0, pr), (0, pc)))


# --------------------------------------------------------------------------
# Kernels
# --------------------------------------------------------------------------
def _noisy_linear_kernel(x_ref, wmu_ref, wsig_ref, eps_out_ref, eps_in_ref,
                         bmu_ref, bsig_ref, beps_ref, o_ref, acc_ref):
    k = pl.program_id(1)  # reduction (In) axis — last grid axis

    @pl.when(k == 0)
    def _():
        acc_ref[...] = jnp.zeros_like(acc_ref)

    # Rank-1 factorised noise built per-tile (never materialised in HBM):
    #   W = w_mu + w_sigma * (eps_out ⊗ eps_in)
    w = wmu_ref[...] + wsig_ref[...] * (eps_out_ref[...] * eps_in_ref[...])  # (To, Ti)

    # x (B, Ti) contracted with w (To, Ti) on the last dim -> (B, To).
    # No in-kernel transpose: MXU consumes the weight tile as-is.
    acc_ref[...] += lax.dot_general(
        x_ref[...], w,
        dimension_numbers=(((1,), (1,)), ((), ())),
        preferred_element_type=jnp.float32)

    @pl.when(k == pl.num_programs(1) - 1)
    def _():
        b = bmu_ref[...] + bsig_ref[...] * beps_ref[...]      # (1, To)
        o_ref[...] = (acc_ref[...] + b).astype(o_ref.dtype)


def _mu_linear_kernel(x_ref, wmu_ref, bmu_ref, o_ref, acc_ref):
    """Eval-mode path: y = x @ w_mu^T + b_mu. No noise streams are DMA'd."""
    k = pl.program_id(1)

    @pl.when(k == 0)
    def _():
        acc_ref[...] = jnp.zeros_like(acc_ref)

    acc_ref[...] += lax.dot_general(
        x_ref[...], wmu_ref[...],
        dimension_numbers=(((1,), (1,)), ((), ())),
        preferred_element_type=jnp.float32)

    @pl.when(k == pl.num_programs(1) - 1)
    def _():
        o_ref[...] = (acc_ref[...] + bmu_ref[...]).astype(o_ref.dtype)


# --------------------------------------------------------------------------
# Wrapper
# --------------------------------------------------------------------------
def noisy_linear_pallas(x, weight_mu, weight_sigma, eps_in, eps_out,
                        bias_mu, bias_sigma, bias_epsilon, training=True):
    """Pallas NoisyLinear.forward.

    training=True : y = x @ (w_mu + w_sigma * (eps_out ⊗ eps_in))^T
                        + (b_mu + b_sigma * b_eps)
    training=False: y = x @ w_mu^T + b_mu     (mu-only kernel)

    eps_in: (In,), eps_out: (Out,) are the factorised noise vectors
    (the outer product eps_out ⊗ eps_in is formed per-tile inside the kernel).
    """
    B, In = x.shape
    Out = weight_mu.shape[0]
    out_dtype = x.dtype

    # ---- padded / tiled geometry -----------------------------------------
    B_pad = _round_up(B, 8)
    In_pad, Ti = _pick_tile(In, _TI_TARGET)
    Out_pad, To = _pick_tile(Out, _TO_TARGET)
    grid = (Out_pad // To, In_pad // Ti)

    # ---- padded operands (zero padding is mathematically inert) ----------
    xp = _pad2d(x, B_pad, In_pad)
    wmu_p = _pad2d(weight_mu, Out_pad, In_pad)
    bmu_p = _pad2d(bias_mu.reshape(1, Out), 1, Out_pad)

    cost = pl.CostEstimate(
        flops=2 * B * In * Out,
        transcendentals=0,
        bytes_accessed=(2 * Out * In + B * In + B * Out + 3 * Out + In) * 4,
    )
    compiler_params = pltpu.CompilerParams(
        dimension_semantics=("parallel", "arbitrary"))

    if not training:
        out = pl.pallas_call(
            _mu_linear_kernel,
            out_shape=jax.ShapeDtypeStruct((B_pad, Out_pad), out_dtype),
            grid_spec=pltpu.PrefetchScalarGridSpec(
                num_scalar_prefetch=0,
                grid=grid,
                in_specs=[
                    pl.BlockSpec((B_pad, Ti), lambda o, k: (0, k)),   # x
                    pl.BlockSpec((To, Ti),    lambda o, k: (o, k)),   # w_mu
                    pl.BlockSpec((1, To),     lambda o, k: (0, o)),   # b_mu
                ],
                out_specs=pl.BlockSpec((B_pad, To), lambda o, k: (0, o)),
                scratch_shapes=[pltpu.VMEM((B_pad, To), jnp.float32)],
            ),
            compiler_params=compiler_params,
            cost_estimate=cost,
        )(xp, wmu_p, bmu_p)
        return out[:B, :Out]

    wsig_p = _pad2d(weight_sigma, Out_pad, In_pad)
    eps_out_p = _pad2d(eps_out.reshape(Out, 1), Out_pad, 1)       # (Out_pad, 1)
    eps_in_p = _pad2d(eps_in.reshape(1, In), 1, In_pad)           # (1, In_pad)
    bsig_p = _pad2d(bias_sigma.reshape(1, Out), 1, Out_pad)
    beps_p = _pad2d(bias_epsilon.reshape(1, Out), 1, Out_pad)

    out = pl.pallas_call(
        _noisy_linear_kernel,
        out_shape=jax.ShapeDtypeStruct((B_pad, Out_pad), out_dtype),
        grid_spec=pltpu.PrefetchScalarGridSpec(
            num_scalar_prefetch=0,
            grid=grid,
            in_specs=[
                pl.BlockSpec((B_pad, Ti), lambda o, k: (0, k)),   # x
                pl.BlockSpec((To, Ti),    lambda o, k: (o, k)),   # w_mu
                pl.BlockSpec((To, Ti),    lambda o, k: (o, k)),   # w_sigma
                pl.BlockSpec((To, 1),     lambda o, k: (o, 0)),   # eps_out
                pl.BlockSpec((1, Ti),     lambda o, k: (0, k)),   # eps_in
                pl.BlockSpec((1, To),     lambda o, k: (0, o)),   # b_mu
                pl.BlockSpec((1, To),     lambda o, k: (0, o)),   # b_sigma
                pl.BlockSpec((1, To),     lambda o, k: (0, o)),   # b_eps
            ],
            out_specs=pl.BlockSpec((B_pad, To), lambda o, k: (0, o)),
            scratch_shapes=[pltpu.VMEM((B_pad, To), jnp.float32)],
        ),
        compiler_params=compiler_params,
        cost_estimate=cost,
    )(xp, wmu_p, wsig_p, eps_out_p, eps_in_p, bmu_p, bsig_p, beps_p)
    return out[:B, :Out]


# ---------------------------------------------------------------------------
# Parameter / noise construction (plain-JAX glue mirroring the PyTorch module)
# ---------------------------------------------------------------------------
def init_noisy_linear_params(key, in_features, out_features, std_init=0.5):
    mu_range = 1.0 / math.sqrt(in_features)
    k_wmu, k_bmu = jax.random.split(key)
    weight_mu = jax.random.uniform(k_wmu, (out_features, in_features),
                                   jnp.float32, -mu_range, mu_range)
    weight_sigma = jnp.full((out_features, in_features),
                            std_init / math.sqrt(in_features), jnp.float32)
    bias_mu = jax.random.uniform(k_bmu, (out_features,),
                                 jnp.float32, -mu_range, mu_range)
    bias_sigma = jnp.full((out_features,),
                          std_init / math.sqrt(out_features), jnp.float32)
    return weight_mu, weight_sigma, bias_mu, bias_sigma


def _scale_noise(key, size):
    x = jax.random.normal(key, (size,), jnp.float32)
    return jnp.sign(x) * jnp.sqrt(jnp.abs(x))


def reset_noise(key, in_features, out_features):
    """Returns the factorised noise (eps_in, eps_out, bias_epsilon).
    weight_epsilon = outer(eps_out, eps_in) is built per-tile inside the kernel,
    never materialised in HBM."""
    k_in, k_out = jax.random.split(key)
    eps_in = _scale_noise(k_in, in_features)
    eps_out = _scale_noise(k_out, out_features)
    return eps_in, eps_out, eps_out   # bias_epsilon = eps_out


# ---------------------------------------------------------------------------
if __name__ == "__main__":
    def _run_case(B, IN, OUT, seed):
        root = jax.random.PRNGKey(seed)
        k_param, k_noise, k_x = jax.random.split(root, 3)

        w_mu, w_sig, b_mu, b_sig = init_noisy_linear_params(k_param, IN, OUT)
        eps_in, eps_out, b_eps = reset_noise(k_noise, IN, OUT)
        x = jax.random.normal(k_x, (B, IN), jnp.float32)

        fwd = jax.jit(functools.partial(noisy_linear_pallas, training=True))
        y = fwd(x, w_mu, w_sig, eps_in, eps_out, b_mu, b_sig, b_eps)
        jax.block_until_ready(y)

        # Plain-JAX reference (training mode).
        w_eff = w_mu + w_sig * jnp.outer(eps_out, eps_in)
        b_eff = b_mu + b_sig * b_eps
        y_ref = x @ w_eff.T + b_eff
        assert y.shape == (B, OUT)
        assert jnp.allclose(y, y_ref, atol=1e-4, rtol=1e-4), "training mismatch"

        # Eval mode (mu-only kernel, no noise traffic).
        fwd_eval = jax.jit(functools.partial(noisy_linear_pallas, training=False))
        y_eval = fwd_eval(x, w_mu, w_sig, eps_in, eps_out, b_mu, b_sig, b_eps)
        jax.block_until_ready(y_eval)
        assert jnp.allclose(y_eval, x @ w_mu.T + b_mu,
                            atol=1e-4, rtol=1e-4), "eval mismatch"

    # Small shapes matching the module's typical use (RL head).
    _run_case(B=8, IN=32, OUT=64, seed=0)
    # Non-aligned shapes that exercise padding + a multi-tile grid (Out- and In-tiled).
    _run_case(B=5, IN=600, OUT=300, seed=1)

    print("KERNEL_OK")
</pallas_src>

<mosaic_0001>
module attributes {stable_mosaic.version = 11 : i64} {
  func.func @_noisy_linear_kernel(%arg0: i32, %arg1: i32, %arg2: memref<8x128xf32, #tpu.memory_space<vmem>>, %arg3: memref<128x128xf32, #tpu.memory_space<vmem>>, %arg4: memref<128x128xf32, #tpu.memory_space<vmem>>, %arg5: memref<128x1xf32, #tpu.memory_space<vmem>>, %arg6: memref<1x128xf32, #tpu.memory_space<vmem>>, %arg7: memref<1x128xf32, #tpu.memory_space<vmem>>, %arg8: memref<1x128xf32, #tpu.memory_space<vmem>>, %arg9: memref<1x128xf32, #tpu.memory_space<vmem>>, %arg10: memref<8x128xf32, #tpu.memory_space<vmem>>, %arg11: memref<8x128xf32, #tpu.memory_space<vmem>>) attributes {dimension_semantics = [#tpu.dimension_semantics<parallel>, #tpu.dimension_semantics<arbitrary>], iteration_bounds = array<i64: 1, 1>, scalar_prefetch = 0 : i64, scratch_operands = 1 : i64, tpu.core_type = #tpu.core_type<tc>, window_params = [{transform_indices = @transform_0, window_bounds = array<i64: 8, 128>}, {transform_indices = @transform_1, window_bounds = array<i64: 128, 128>}, {transform_indices = @transform_2, window_bounds = array<i64: 128, 128>}, {transform_indices = @transform_3, window_bounds = array<i64: 128, 1>}, {transform_indices = @transform_4, window_bounds = array<i64: 1, 128>}, {transform_indices = @transform_5, window_bounds = array<i64: 1, 128>}, {transform_indices = @transform_6, window_bounds = array<i64: 1, 128>}, {transform_indices = @transform_7, window_bounds = array<i64: 1, 128>}, {transform_indices = @transform_8, window_bounds = array<i64: 8, 128>}]} {
    %c0_i32 = arith.constant 0 : i32
    %0 = arith.cmpi eq, %arg1, %c0_i32 : i32
    %1 = arith.extui %0 : i1 to i32
    %c0_i32_0 = arith.constant 0 : i32
    %2 = arith.cmpi ne, %1, %c0_i32_0 : i32
    scf.if %2 {
      %cst_16 = arith.constant 0.000000e+00 : f32
      %20 = vector.broadcast %cst_16 : f32 to vector<8x128xf32>
      %c0_17 = arith.constant 0 : index
      %c0_18 = arith.constant 0 : index
      %21 = vector.load %arg11[%c0_17, %c0_18] : memref<8x128xf32, #tpu.memory_space<vmem>>, vector<8x128xf32>
      tpu.vector_store %arg11[%c0_17, %c0_18], %20 {strides = array<i32>} : memref<8x128xf32, #tpu.memory_space<vmem>>, vector<8x128xf32>,
    } else {
    }
    %c0 = arith.constant 0 : index
    %c0_1 = arith.constant 0 : index
    %3 = vector.load %arg3[%c0, %c0_1] : memref<128x128xf32, #tpu.memory_space<vmem>>, vector<128x128xf32>
    %c0_2 = arith.constant 0 : index
    %c0_3 = arith.constant 0 : index
    %4 = vector.load %arg4[%c0_2, %c0_3] : memref<128x128xf32, #tpu.memory_space<vmem>>, vector<128x128xf32>
    %c0_4 = arith.constant 0 : index
    %c0_5 = arith.constant 0 : index
    %5 = vector.load %arg5[%c0_4, %c0_5] : memref<128x1xf32, #tpu.memory_space<vmem>>, vector<128x1xf32>
    %c0_6 = arith.constant 0 : index
    %c0_7 = arith.constant 0 : index
    %6 = vector.load %arg6[%c0_6, %c0_7] : memref<1x128xf32, #tpu.memory_space<vmem>>, vector<1x128xf32>
    %7 = vector.broadcast %5 : vector<128x1xf32> to vector<128x128xf32>
    %8 = vector.broadcast %6 : vector<1x128xf32> to vector<128x128xf32>
    %9 = arith.mulf %7, %8 : vector<128x128xf32>
    %10 = arith.mulf %4, %9 : vector<128x128xf32>
    %11 = arith.addf %3, %10 : vector<128x128xf32>
    %c0_8 = arith.constant 0 : index
    %c0_9 = arith.constant 0 : index
    %12 = vector.load %arg11[%c0_8, %c0_9] : memref<8x128xf32, #tpu.memory_space<vmem>>, vector<8x128xf32>
    %c0_10 = arith.constant 0 : index
    %c0_11 = arith.constant 0 : index
    %13 = vector.load %arg2[%c0_10, %c0_11] : memref<8x128xf32, #tpu.memory_space<vmem>>, vector<8x128xf32>
    %cst = arith.constant dense<0.000000e+00> : vector<8x128xf32>
    %14 = tpu.matmul %13, %11, %cst {dimension_numbers = #tpu.dot_dimension_numbers<[1], [1], [0], [0], [0, 0, 1, 0], [], []>} : vector<8x128xf32>, vector<128x128xf32>, vector<8x128xf32> -> vector<8x128xf32>
    %15 = arith.addf %12, %14 : vector<8x128xf32>
    %c0_12 = arith.constant 0 : index
    %c0_13 = arith.constant 0 : index
    %16 = vector.load %arg11[%c0_12, %c0_13] : memref<8x128xf32, #tpu.memory_space<vmem>>, vector<8x128xf32>
    tpu.vector_store %arg11[%c0_12, %c0_13], %15 {strides = array<i32>} : memref<8x128xf32, #tpu.memory_space<vmem>>, vector<8x128xf32>,
    %c0_i32_14 = arith.constant 0 : i32
    %17 = arith.cmpi eq, %arg1, %c0_i32_14 : i32
    %18 = arith.extui %17 : i1 to i32
    %c0_i32_15 = arith.constant 0 : i32
    %19 = arith.cmpi ne, %18, %c0_i32_15 : i32
    scf.if %19 {
      %c0_16 = arith.constant 0 : index
      %c0_17 = arith.constant 0 : index
      %20 = vector.load %arg7[%c0_16, %c0_17] : memref<1x128xf32, #tpu.memory_space<vmem>>, vector<1x128xf32>
      %c0_18 = arith.constant 0 : index
      %c0_19 = arith.constant 0 : index
      %21 = vector.load %arg8[%c0_18, %c0_19] : memref<1x128xf32, #tpu.memory_space<vmem>>, vector<1x128xf32>
      %c0_20 = arith.constant 0 : index
      %c0_21 = arith.constant 0 : index
      %22 = vector.load %arg9[%c0_20, %c0_21] : memref<1x128xf32, #tpu.memory_space<vmem>>, vector<1x128xf32>
      %23 = arith.mulf %21, %22 : vector<1x128xf32>
      %24 = arith.addf %20, %23 : vector<1x128xf32>
      %c0_22 = arith.constant 0 : index
      %c0_23 = arith.constant 0 : index
      %25 = vector.load %arg11[%c0_22, %c0_23] : memref<8x128xf32, #tpu.memory_space<vmem>>, vector<8x128xf32>
      %26 = vector.broadcast %24 : vector<1x128xf32> to vector<8x128xf32>
      %27 = arith.addf %25, %26 : vector<8x128xf32>
      %c0_24 = arith.constant 0 : index
      %c0_25 = arith.constant 0 : index
      %28 = vector.load %arg10[%c0_24, %c0_25] : memref<8x128xf32, #tpu.memory_space<vmem>>, vector<8x128xf32>
      tpu.vector_store %arg10[%c0_24, %c0_25], %27 {strides = array<i32>} : memref<8x128xf32, #tpu.memory_space<vmem>>, vector<8x128xf32>,
    } else {
    }
    return
  }
  func.func @transform_0(%arg0: i32, %arg1: i32) -> (i32, i32) {
    %c0_i32 = arith.constant 0 : i32
    %c0_i32_0 = arith.constant 0 : i32
    return %c0_i32, %arg1 : i32, i32
  }
  func.func @transform_1(%arg0: i32, %arg1: i32) -> (i32, i32) {
    %c0_i32 = arith.constant 0 : i32
    return %arg0, %arg1 : i32, i32
  }
  func.func @transform_2(%arg0: i32, %arg1: i32) -> (i32, i32) {
    %c0_i32 = arith.constant 0 : i32
    return %arg0, %arg1 : i32, i32
  }
  func.func @transform_3(%arg0: i32, %arg1: i32) -> (i32, i32) {
    %c0_i32 = arith.constant 0 : i32
    %c0_i32_0 = arith.constant 0 : i32
    return %arg0, %c0_i32 : i32, i32
  }
  func.func @transform_4(%arg0: i32, %arg1: i32) -> (i32, i32) {
    %c0_i32 = arith.constant 0 : i32
    %c0_i32_0 = arith.constant 0 : i32
    return %c0_i32, %arg1 : i32, i32
  }
  func.func @transform_5(%arg0: i32, %arg1: i32) -> (i32, i32) {
    %c0_i32 = arith.constant 0 : i32
    %c0_i32_0 = arith.constant 0 : i32
    return %c0_i32, %arg0 : i32, i32
  }
  func.func @transform_6(%arg0: i32, %arg1: i32) -> (i32, i32) {
    %c0_i32 = arith.constant 0 : i32
    %c0_i32_0 = arith.constant 0 : i32
    return %c0_i32, %arg0 : i32, i32
  }
  func.func @transform_7(%arg0: i32, %arg1: i32) -> (i32, i32) {
    %c0_i32 = arith.constant 0 : i32
    %c0_i32_0 = arith.constant 0 : i32
    return %c0_i32, %arg0 : i32, i32
  }
  func.func @transform_8(%arg0: i32, %arg1: i32) -> (i32, i32) {
    %c0_i32 = arith.constant 0 : i32
    %c0_i32_0 = arith.constant 0 : i32
    return %c0_i32, %arg0 : i32, i32
  }
}

</mosaic_0001>

<bundles_post_ra>
// kernel: noisy_linear_pallas.1
= control target key start
LH: loop header
LB: loop body
LE: loop exit
PB: predicated region body
PF: predicated region fallthrough
CT: control target
= control target key end

     0   :  { %v404_v2 = vmov 0   ;;  %v405_v5 = vmov 0.0   ;;  %s650_s0 = inlined_call_operand.vmem [shape: f32[8,128], index: 0, kind: input, shape index: {}]   ;;  %s651_s1 = inlined_call_operand.vmem [shape: f32[128,128], index: 1, kind: input, shape index: {}]   ;;  %s652_s2 = inlined_call_operand.vmem [shape: f32[128,128], index: 2, kind: input, shape index: {}]   ;;  %s653_s3 = inlined_call_operand.vmem [shape: f32[128,1], index: 3, kind: input, shape index: {}]   ;;  %s654_s4 = inlined_call_operand.vmem [shape: f32[1,128], index: 4, kind: input, shape index: {}]   ;;  %s655_s5 = inlined_call_operand.vmem [shape: f32[1,128], index: 5, kind: input, shape index: {}]   ;;  %s656_s6 = inlined_call_operand.vmem [shape: f32[1,128], index: 6, kind: input, shape index: {}]   ;;  %s657_s7 = inlined_call_operand.vmem [shape: f32[1,128], index: 7, kind: input, shape index: {}]   ;;  %s658_s8 = inlined_call_operand.hbm [shape: f32[8,128], index: 8, kind: output, shape index: {}]  }
   0x1   :  { %v82_v0 = vld [vmem:[%s653_s3 + $0x78] sm:$0xff]  ;;  %v80_v1 = vld [vmem:[%s653_s3 + $0x68] sm:$0xff]  ;;  %381 = vset.pattern.permute.xlu1 %v404_v2  ;;  %380 = vset.pattern.permute.xlu0 %v404_v2  ;;  %v81_v3 = vld [vmem:[%s653_s3 + $0x70] sm:$0xff] }
   0x2   :  { %161 = vperm.xlu0 %380, %v82_v0   ;;  %151 = vperm.xlu1 %381, %v80_v1   ;;  %v79_v4 = vld [vmem:[%s653_s3 + $0x60] sm:$0xff]  ;;  %v78_v6 = vld [vmem:[%s653_s3 + $0x58] sm:$0xff]  ;;  %v77_v7 = vld [vmem:[%s653_s3 + $0x50] sm:$0xff] }
   0x3   :  { %341 = vmatprep.subr.mxu0 %v405_v5 }
   0x6   :  { %156 = vperm.xlu0 %380, %v81_v3   ;;  %146 = vperm.xlu1 %381, %v79_v4  }
   0x7   :  { %13 = vsyncpa [#allocation4], 0  ;;  %v76_v8 = vld [vmem:[%s653_s3 + $0x48] sm:$0xff]  ;;  %v75_v9 = vld [vmem:[%s653_s3 + $0x40] sm:$0xff]  ;;  %vm406_vm0 = vmmov 0  }
   0x8   :  { %v74_v10 = vld [vmem:[%s653_s3 + $0x38] sm:$0xff]  ;;  %v73_v11 = vld [vmem:[%s653_s3 + $0x30] sm:$0xff]  ;;  %v72_v12 = vld [vmem:[%s653_s3 + $0x28] sm:$0xff]  ;;  %373 = vmatprep.mubr.msk.f32.mxu0 %vm406_vm0, %v405_v5 }
   0x9   :  { %v71_v13 = vld [vmem:[%s653_s3 + $0x20] sm:$0xff]  ;;  %v70_v14 = vld [vmem:[%s653_s3 + $0x18] sm:$0xff]  ;;  %v69_v15 = vld [vmem:[%s653_s3 + $0x10] sm:$0xff] }
   0xa   :  { %141 = vperm.xlu0 %380, %v78_v6   ;;  %136 = vperm.xlu1 %381, %v77_v7   ;;  %v68_v16 = vld [vmem:[%s653_s3 + $0x8] sm:$0xff]  ;;  %v67_v17 = vld [vmem:[%s653_s3] sm:$0xff]  ;;  %v66_v20 = vld [vmem:[%s652_s2 + $0x78] sm:$0xff] }
   0xb   :  { %v506_v18 = vld [vmem:[%s654_s4] ss:$0 sm:$0xff]  ;;  %v50_v23 = vld [vmem:[%s651_s1 + $0x78] sm:$0xff]  ;;  %v64_v26 = vld [vmem:[%s652_s2 + $0x68] sm:$0xff] }
   0xc   :  { %v65_v28 = vld [vmem:[%s652_s2 + $0x70] sm:$0xff]  ;;  %v48_v35 = vld [vmem:[%s651_s1 + $0x68] sm:$0xff]  ;;  %v63_v38 = vld [vmem:[%s652_s2 + $0x60] sm:$0xff] }
   0xd   :  { %v49_v31 = vld [vmem:[%s651_s1 + $0x70] sm:$0xff]  ;;  %v62_v43 = vld [vmem:[%s652_s2 + $0x58] sm:$0xff]  ;;  %v47_v45 = vld [vmem:[%s651_s1 + $0x60] sm:$0xff] }
   0xe   :  { %131 = vperm.xlu0 %380, %v76_v8   ;;  %126 = vperm.xlu1 %381, %v75_v9   ;;  %v61_v49 = vld [vmem:[%s652_s2 + $0x50] sm:$0xff]  ;;  %v46_v51 = vld [vmem:[%s651_s1 + $0x58] sm:$0xff]  ;;  %v60_v55 = vld [vmem:[%s652_s2 + $0x48] sm:$0xff] }
   0xf   :  { %v45_v57 = vld [vmem:[%s651_s1 + $0x50] sm:$0xff]  ;;  %v59_v61 = vld [vmem:[%s652_s2 + $0x40] sm:$0xff]  ;;  %v44_v63 = vld [vmem:[%s651_s1 + $0x48] sm:$0xff] }
  0x10   :  { %v58_v3 = vld [vmem:[%s652_s2 + $0x38] sm:$0xff]  ;;  %v43_v6 = vld [vmem:[%s651_s1 + $0x40] sm:$0xff] }
  0x12   :  { %121 = vperm.xlu0 %380, %v74_v10   ;;  %116 = vperm.xlu1 %381, %v73_v11   ;;  %v57_v10 = vld [vmem:[%s652_s2 + $0x30] sm:$0xff] }
  0x16   :  { %111 = vperm.xlu0 %380, %v72_v12   ;;  %106 = vperm.xlu1 %381, %v71_v13   ;;  %v42_v12 = vld [vmem:[%s651_s1 + $0x38] sm:$0xff] }
  0x1a   :  { %101 = vperm.xlu0 %380, %v70_v14   ;;  %96 = vperm.xlu1 %381, %v69_v15  }
  0x1e   :  { %91 = vperm.xlu0 %380, %v68_v16   ;;  %86 = vperm.xlu1 %381, %v67_v17   ;;  %v56_v16 = vld [vmem:[%s652_s2 + $0x28] sm:$0xff] }
  0x7d   :  { %v162_v19 = vpop.permute.xlu0 %161  ;;  %v152_v22 = vpop.permute.xlu1 %151 }
  0x7e   :  { %v185_v21 = vmul.f32 %v506_v18, %v162_v19  ;;  %v183_v25 = vmul.f32 %v506_v18, %v152_v22  ;;  %v41_v19 = vld [vmem:[%s651_s1 + $0x30] sm:$0xff] }
  0x80   :  { %v201_v24 = vmul.f32 %v185_v21, %v66_v20  ;;  %v199_v32 = vmul.f32 %v183_v25, %v64_v26  ;;  %v40_v25 = vld [vmem:[%s651_s1 + $0x28] sm:$0xff] }
  0x81   :  { %v157_v27 = vpop.permute.xlu0 %156  ;;  %v147_v34 = vpop.permute.xlu1 %146 }
  0x82   :  { %v184_v29 = vmul.f32 %v506_v18, %v157_v27  ;;  %v217_v30 = vadd.f32 %v201_v24, %v50_v23  ;;  %v182_v36 = vmul.f32 %v506_v18, %v147_v34  ;;  %v215_v40 = vadd.f32 %v199_v32, %v48_v35  ;;  %v55_v23 = vld [vmem:[%s652_s2 + $0x20] sm:$0xff]  ;;  %v53_v35 = vld [vmem:[%s652_s2 + $0x10] sm:$0xff] }
  0x84   :  { %v200_v33 = vmul.f32 %v184_v29, %v65_v28  ;;  %342 = vmatpush3.xpose.msra.mxu0 %v217_v30  ;;  %v198_v41 = vmul.f32 %v182_v36, %v63_v38  ;;  %v54_v29 = vld [vmem:[%s652_s2 + $0x18] sm:$0xff] }
  0x85   :  { %343 = vmatprep.subr.mxu0 %v405_v5  ;;  %v142_v39 = vpop.permute.xlu0 %141  ;;  %v137_v44 = vpop.permute.xlu1 %136 }
  0x86   :  { %v216_v37 = vadd.f32 %v200_v33, %v49_v31  ;;  %v181_v42 = vmul.f32 %v506_v18, %v142_v39  ;;  %v180_v47 = vmul.f32 %v506_v18, %v137_v44  ;;  %v214_v48 = vadd.f32 %v198_v41, %v47_v45  ;;  %v39_v31 = vld [vmem:[%s651_s1 + $0x20] sm:$0xff]  ;;  %v52_v41 = vld [vmem:[%s652_s2 + $0x8] sm:$0xff] }
  0x88   :  { %344 = vmatpush3.xpose.msra.mxu0 %v216_v37  ;;  %v197_v46 = vmul.f32 %v181_v42, %v62_v43  ;;  %v196_v52 = vmul.f32 %v180_v47, %v61_v49  ;;  %v38_v37 = vld [vmem:[%s651_s1 + $0x18] sm:$0xff]  ;;  %v37_v43 = vld [vmem:[%s651_s1 + $0x10] sm:$0xff]  ;;  %v51_v47 = vld [vmem:[%s652_s2] sm:$0xff] }
  0x89   :  { %345 = vmatprep.subr.mxu0 %v405_v5  ;;  %v132_v50 = vpop.permute.xlu0 %131  ;;  %v127_v56 = vpop.permute.xlu1 %126 }
  0x8a   :  { %v179_v53 = vmul.f32 %v506_v18, %v132_v50  ;;  %v213_v54 = vadd.f32 %v197_v46, %v46_v51  ;;  %v178_v59 = vmul.f32 %v506_v18, %v127_v56  ;;  %v212_v60 = vadd.f32 %v196_v52, %v45_v57  ;;  %v35_v51 = vld [vmem:[%s651_s1] sm:$0xff] }
  0x8b   :  { %v219_v52 = vld [vmem:[%s650_s0] sm:$0xff]  ;;  %s407_s0 = smov [#allocation3]  }
  0x8c   :  { %346 = vmatpush3.xpose.msra.mxu0 %v215_v40  ;;  %v195_v58 = vmul.f32 %v179_v53, %v60_v55  ;;  %v194_v0 = vmul.f32 %v178_v59, %v59_v61  ;;  %v302_v53 = vlaneseq  ;;  %v297_v55 = vld [vmem:[%s657_s7] sm:$0x1]  ;;  %s315_s15 = sshll.u32 %s407_s0, 4  ;;  %s316_s15 = int_to_ptr.vmem [resolvable:$true] %s315_s15 }
  0x8d   :  { %347 = vmatprep.subr.mxu0 %v405_v5  ;;  %v122_v62 = vpop.permute.xlu0 %121  ;;  %v117_v4 = vpop.permute.xlu1 %116  ;;  %p387_p1 = scmp.lt.s32.totalorder %s316_s15, %s316_s15 }
  0x8e   :  { %v177_v1 = vmul.f32 %v506_v18, %v122_v62  ;;  %v211_v2 = vadd.f32 %v195_v58, %v44_v63  ;;  %v176_v8 = vmul.f32 %v506_v18, %v117_v4  ;;  %v210_v9 = vadd.f32 %v194_v0, %v43_v6 }
  0x8f   :  { %v303_v57 = vshrl.u32 %v302_v53, 7 }
  0x90   :  { %348 = vmatpush3.xpose.msra.mxu0 %v214_v48  ;;  %v193_v7 = vmul.f32 %v177_v1, %v58_v3  ;;  %v192_v13 = vmul.f32 %v176_v8, %v57_v10  ;;  %v36_v48 = vld [vmem:[%s651_s1 + $0x8] sm:$0xff] }
  0x91   :  { %349 = vmatprep.subr.mxu0 %v405_v5  ;;  %v112_v11 = vpop.permute.xlu0 %111  ;;  %v107_v17 = vpop.permute.xlu1 %106  ;;  %v304_v59 = vsub.s32 0, %v303_v57 }
  0x92   :  { %v175_v14 = vmul.f32 %v506_v18, %v112_v11  ;;  %v209_v15 = vadd.f32 %v193_v7, %v42_v12  ;;  %v174_v21 = vmul.f32 %v506_v18, %v107_v17  ;;  %v208_v22 = vadd.f32 %v192_v13, %v41_v19 }
  0x94   :  { %350 = vmatpush3.xpose.msra.mxu0 %v213_v54  ;;  %v191_v20 = vmul.f32 %v175_v14, %v56_v16  ;;  %v190_v26 = vmul.f32 %v174_v21, %v55_v23  ;;  %v296_v54 = vld [vmem:[%s656_s6] sm:$0x1]  ;;  %s382_s6 = scalar_lea.vmem %s316_s15, 128 }
  0x95   :  { %351 = vmatprep.subr.mxu0 %v405_v5  ;;  %v102_v24 = vpop.permute.xlu0 %101  ;;  %v97_v30 = vpop.permute.xlu1 %96  ;;  %v298_v56 = vmul.f32 %v297_v55, %v296_v54  ;;  %p383_p0 = scmp.ne.s32.totalorder %s316_s15, %s382_s6  ;;  %p388_p2 = scmp.lt.s32.totalorder %s382_s6, %s382_s6 }
  0x96   :  { %v173_v27 = vmul.f32 %v506_v18, %v102_v24  ;;  %v207_v28 = vadd.f32 %v191_v20, %v40_v25  ;;  %v172_v33 = vmul.f32 %v506_v18, %v97_v30  ;;  %v206_v34 = vadd.f32 %v190_v26, %v39_v31 }
  0x97   :  { %p389_p3 = por %p388_p2, %p387_p1 }
  0x98   :  { %352 = vmatpush3.xpose.msra.mxu0 %v212_v60  ;;  %v189_v32 = vmul.f32 %v173_v27, %v54_v29  ;;  %v188_v38 = vmul.f32 %v172_v33, %v53_v35 }
  0x99   :  { %353 = vmatprep.subr.mxu0 %v405_v5  ;;  %v92_v36 = vpop.permute.xlu0 %91  ;;  %v87_v42 = vpop.permute.xlu1 %86  ;;  %p390_p4 = pnand %p389_p3, %p383_p0 }
  0x9a   :  { %v171_v39 = vmul.f32 %v506_v18, %v92_v36  ;;  %v205_v40 = vadd.f32 %v189_v32, %v38_v37  ;;  %v170_v45 = vmul.f32 %v506_v18, %v87_v42  ;;  %v204_v46 = vadd.f32 %v188_v38, %v37_v43 }
  0x9c   :  { %354 = vmatpush3.xpose.msra.mxu0 %v211_v2  ;;  %v187_v44 = vmul.f32 %v171_v39, %v52_v41  ;;  %v186_v49 = vmul.f32 %v170_v45, %v51_v47 }
  0x9d   :  { %355 = vmatprep.subr.mxu0 %v405_v5 }
  0x9e   :  { %v203_v50 = vadd.f32 %v187_v44, %v36_v48  ;;  %v202_v18 = vadd.f32 %v186_v49, %v35_v51 }
  0xa0   :  { %356 = vmatpush3.xpose.msra.mxu0 %v210_v9 }
  0xa1   :  { %357 = vmatprep.subr.mxu0 %v405_v5 }
  0xa4   :  { %358 = vmatpush3.xpose.msra.mxu0 %v209_v15 }
  0xa5   :  { %359 = vmatprep.subr.mxu0 %v405_v5 }
  0xa8   :  { %360 = vmatpush3.xpose.msra.mxu0 %v208_v22 }
  0xa9   :  { %361 = vmatprep.subr.mxu0 %v405_v5 }
  0xac   :  { %362 = vmatpush3.xpose.msra.mxu0 %v207_v28 }
  0xad   :  { %363 = vmatprep.subr.mxu0 %v405_v5 }
  0xb0   :  { %364 = vmatpush3.xpose.msra.mxu0 %v206_v34 }
  0xb1   :  { %365 = vmatprep.subr.mxu0 %v405_v5 }
  0xb4   :  { %366 = vmatpush3.xpose.msra.mxu0 %v205_v40 }
  0xb5   :  { %367 = vmatprep.subr.mxu0 %v405_v5 }
  0xb8   :  { %368 = vmatpush3.xpose.msra.mxu0 %v204_v46 }
  0xb9   :  { %369 = vmatprep.subr.mxu0 %v405_v5 }
  0xbc   :  { %370 = vmatpush3.xpose.msra.mxu0 %v203_v50 }
  0xbd   :  { %371 = vmatprep.subr.mxu0 %v405_v5  ;;  %v295_v5 = vld [vmem:[%s655_s5] sm:$0x1] }
  0xbe   :  { %v299_v58 = vadd.f32 %v298_v56, %v295_v5 }
  0xc0   :  { %372 = vmatpush3.xpose.msra.mxu0 %v202_v18  ;;  %v305_v60 = vrot.slane %v299_v58, %v304_v59 }
  0xc3   :  { %374 = vmatmul.mubr.f32.vlgmr.msra.gmra.mxu0 %v219_v52 }
 0x183   :  { %v286_v61 = vpop.f32.mrf.mxu0 }
 0x184   :  { %v307_v62 = vadd.f32 %v305_v60, %v286_v61 }
 0x185   :  { %v375_v63 = vpop.f32.mrf.mxu0 }
 0x186   :  { %308 = vst [vmem:[#allocation3] sm:$0xff] %v307_v62 }
 0x187   :  { %393 = shalt.err (!%p390_p4)
}
 0x188   :  { %318 = dma.vmem_to_hbm [thread:$0]  %s316_s15, 128, %s658_s8, [#allocation4]  }
 0x189   :  { %402 = dma.done.wait [#allocation4], 128  }
 0x18a   :  { %403 = vsyncadd [#allocation4], 4294967168 }
 0x18b   :  { %322 = vsyncpa [#allocation4], 1 }

</bundles_post_ra>
